<compile_context>
chip_gen: v5e
topology: v5e:2x2
jax: 0.10.0
libtpu: 0.0.40
codegen_flags: <defaults>
</compile_context>

<pallas_src>
import jax
import jax.numpy as jnp
from jax import lax
from jax.experimental import pallas as pl
from jax.experimental.pallas import tpu as pltpu

HIDDEN = 128


def _round_up(x, m):
    return ((x + m - 1) // m) * m


def _pick_sub(tile_rows):
    # Sub-block row count for the in-kernel fused loop (review item: keep the
    # live f32 intermediate around 512 rows so it stays register/VMEM friendly).
    for s in (512, 256, 128):
        if tile_rows % s == 0:
            return s
    return tile_rows


def _make_kernel(sub, num_sub):
    def kernel(zs_ref, zd_ref, w1s_ref, w1d_ref, b1_ref, w2_ref, b2_ref,
               out_ref):
        # Resident (constant index_map) parameters -> load once per grid step.
        w1s = w1s_ref[...]
        w1d = w1d_ref[...]
        b1 = b1_ref[...]
        w2 = w2_ref[...]
        b2 = b2_ref[...]

        # Fully-unrolled sub-block loop: static starts -> static ref slices
        # (zero-cost views); each sub-block's h is consumed immediately so the
        # (tile_rows,128) f32 intermediate never round-trips VMEM.
        for j in range(num_sub):
            r = j * sub
            zs = zs_ref[r:r + sub, :]          # (sub, C), activation dtype
            zd = zd_ref[r:r + sub, :]          # (sub, C)

            # Fused "concat + lin1" without the lane concat:
            #   cat([zs, zd], -1) @ W1  ==  zs @ W1[:C] + zd @ W1[C:]
            h = jnp.dot(zs, w1s, preferred_element_type=jnp.float32)
            h = h + jnp.dot(zd, w1d, preferred_element_type=jnp.float32)
            h = jnp.maximum(h + b1, 0.0)       # bias + ReLU in f32

            # F.dropout with training=False (eval mode) is the identity.
            # TODO(synk): training-mode dropout would use pltpu.prng_seed /
            #             pltpu.prng_random_bits to build the keep mask.

            # lin2 as (1,128) x (sub,128)^T -> (1,sub): lane-dense result row,
            # no 128x1 MXU result and no relayout of the output.
            o = lax.dot_general(w2, h,
                                dimension_numbers=(((1,), (1,)), ((), ())),
                                preferred_element_type=jnp.float32)
            out_ref[:, r:r + sub] = (o + b2).astype(out_ref.dtype)

    return kernel


def link_predictor(z_src, z_dst, w1, b1, w2, b2, *, tile_rows=2048):
    """z_src/z_dst: (N, C).  w1: (2C, 128), b1: (128,), w2: (128, 1), b2: (1,)."""
    N, C = z_src.shape
    assert z_dst.shape == (N, C)
    assert w1.shape == (2 * C, HIDDEN)
    # Dtype contract: activations must already share a dtype; no silent full
    # activation cast here (it would be an extra HBM pass on a mem-bound op).
    assert z_src.dtype == z_dst.dtype, "z_src and z_dst must share a dtype"
    act_dtype = z_src.dtype

    # Tiny parameters: cast W1 halves to the activation dtype (MXU operands
    # must match); bias / W2 / accumulation stay in f32 (v5e-safe).
    w1 = jnp.asarray(w1)
    w1_src = w1[:C, :].astype(act_dtype)
    w1_dst = w1[C:, :].astype(act_dtype)
    b1 = jnp.asarray(b1, jnp.float32).reshape(1, HIDDEN)
    w2_row = jnp.asarray(w2, jnp.float32).reshape(1, HIDDEN)
    b2 = jnp.asarray(b2, jnp.float32).reshape(1, 1)

    # Tile sizing.
    n_pad8 = _round_up(max(N, 1), 8)
    if n_pad8 <= 256:
        # Genuinely small problem: one grid step, sublane-rounded tile.
        tile_rows = n_pad8
        num_tiles = 1
    else:
        tile_rows = max(128, _round_up(tile_rows, 128))
        # Keep >= 2 grid steps so v7x's 2 TensorCores both get work.
        tile_rows = min(tile_rows, _round_up(pl.cdiv(N, 2), 128))
        num_tiles = pl.cdiv(N, tile_rows)

    sub = _pick_sub(tile_rows)
    num_sub = tile_rows // sub

    itemsize = jnp.dtype(act_dtype).itemsize
    cost = pl.CostEstimate(
        flops=2 * N * (2 * C * HIDDEN + HIDDEN),
        transcendentals=0,
        bytes_accessed=(N * 2 * C * itemsize          # activations in
                        + 2 * C * HIDDEN * itemsize   # W1
                        + (2 * HIDDEN + 1) * 4        # b1, W2, b2
                        + N * 4),                     # output
    )

    out_flat = pl.pallas_call(
        _make_kernel(sub, num_sub),
        out_shape=jax.ShapeDtypeStruct((1, num_tiles * tile_rows), jnp.float32),
        grid_spec=pltpu.PrefetchScalarGridSpec(
            num_scalar_prefetch=0,
            grid=(num_tiles,),
            in_specs=[
                pl.BlockSpec((tile_rows, C), lambda i: (i, 0)),   # z_src tile
                pl.BlockSpec((tile_rows, C), lambda i: (i, 0)),   # z_dst tile
                pl.BlockSpec((C, HIDDEN), lambda i: (0, 0)),      # W1[:C]  (resident)
                pl.BlockSpec((C, HIDDEN), lambda i: (0, 0)),      # W1[C:]  (resident)
                pl.BlockSpec((1, HIDDEN), lambda i: (0, 0)),      # b1      (resident)
                pl.BlockSpec((1, HIDDEN), lambda i: (0, 0)),      # W2 row  (resident)
                pl.BlockSpec((1, 1), lambda i: (0, 0)),           # b2      (resident)
            ],
            # Lane-dense output row per grid step (unmasked stores/DMA).
            out_specs=pl.BlockSpec((1, tile_rows), lambda i: (0, i)),
        ),
        compiler_params=pltpu.CompilerParams(
            dimension_semantics=("parallel",)),   # megacore-shardable on v7x
        cost_estimate=cost,
    )(z_src, z_dst, w1_src, w1_dst, b1, w2_row, b2)

    # Drop ragged-tail padding and restore the (N, 1) module output shape.
    return out_flat.reshape(-1)[:N].reshape(N, 1)


def reference(z_src, z_dst, w1, b1, w2, b2):
    x = jnp.concatenate([z_src, z_dst], axis=-1)
    h = jnp.maximum(x @ w1 + b1.reshape(1, -1), 0.0)
    return h @ w2.reshape(-1, 1) + b2.reshape(1, 1)


if __name__ == "__main__":
    in_channels = 32      # C

    key = jax.random.PRNGKey(0)
    k_zs, k_zd, k_w1, k_b1, k_w2, k_b2 = jax.random.split(key, 6)

    # Deterministic synthetic parameters (shapes from nn.Linear in __init__,
    # stored as [in, out]).
    w1 = jax.random.normal(k_w1, (2 * in_channels, HIDDEN), jnp.float32) * 0.1
    b1 = jax.random.normal(k_b1, (HIDDEN,), jnp.float32) * 0.1
    w2 = jax.random.normal(k_w2, (HIDDEN, 1), jnp.float32) * 0.1
    b2 = jax.random.normal(k_b2, (1,), jnp.float32) * 0.1

    # ---- test 1: small f32 problem, single tile -------------------------
    n_edges = 8
    z_src = jax.random.normal(k_zs, (n_edges, in_channels), jnp.float32)
    z_dst = jax.random.normal(k_zd, (n_edges, in_channels), jnp.float32)

    out = jax.block_until_ready(link_predictor(z_src, z_dst, w1, b1, w2, b2))
    ref = reference(z_src, z_dst, w1, b1, w2, b2)
    assert out.shape == (n_edges, 1)
    assert jnp.allclose(out, ref, atol=1e-4, rtol=1e-4), "f32 mismatch vs reference"

    # ---- test 2: bf16 activations, multi-tile grid + ragged tail --------
    n_edges2 = 300
    z_src2 = jax.random.normal(k_zs, (n_edges2, in_channels), jnp.bfloat16)
    z_dst2 = jax.random.normal(k_zd, (n_edges2, in_channels), jnp.bfloat16)

    out2 = jax.block_until_ready(
        link_predictor(z_src2, z_dst2, w1, b1, w2, b2, tile_rows=128))
    ref2 = reference(z_src2.astype(jnp.float32), z_dst2.astype(jnp.float32),
                     w1.astype(jnp.bfloat16).astype(jnp.float32), b1, w2, b2)
    assert out2.shape == (n_edges2, 1)
    assert jnp.allclose(out2, ref2, atol=1e-2, rtol=1e-2), "bf16 mismatch vs reference"

    # ---- test 3: default big tile (2048), multi-tile + sub-block loop ---
    n_edges3 = 4500
    z_src3 = jax.random.normal(k_zs, (n_edges3, in_channels), jnp.float32)
    z_dst3 = jax.random.normal(k_zd, (n_edges3, in_channels), jnp.float32)

    out3 = jax.block_until_ready(link_predictor(z_src3, z_dst3, w1, b1, w2, b2))
    ref3 = reference(z_src3, z_dst3, w1, b1, w2, b2)
    assert out3.shape == (n_edges3, 1)
    assert jnp.allclose(out3, ref3, atol=1e-4, rtol=1e-4), "big-tile mismatch vs reference"

    print("KERNEL_OK")
</pallas_src>

<mosaic_0001>
module attributes {stable_mosaic.version = 11 : i64} {
  func.func @kernel(%arg0: i32, %arg1: memref<8x32xf32, #tpu.memory_space<vmem>>, %arg2: memref<8x32xf32, #tpu.memory_space<vmem>>, %arg3: memref<32x128xf32, #tpu.memory_space<vmem>>, %arg4: memref<32x128xf32, #tpu.memory_space<vmem>>, %arg5: memref<1x128xf32, #tpu.memory_space<vmem>>, %arg6: memref<1x128xf32, #tpu.memory_space<vmem>>, %arg7: memref<1x1xf32, #tpu.memory_space<vmem>>, %arg8: memref<1x8xf32, #tpu.memory_space<vmem>>) attributes {dimension_semantics = [#tpu.dimension_semantics<parallel>], iteration_bounds = array<i64: 1>, scalar_prefetch = 0 : i64, scratch_operands = 0 : i64, tpu.core_type = #tpu.core_type<tc>, window_params = [{transform_indices = @transform_0, window_bounds = array<i64: 8, 32>}, {transform_indices = @transform_1, window_bounds = array<i64: 8, 32>}, {pipeline_mode = #tpu.pipeline_mode<synchronous>, transform_indices = @transform_2, window_bounds = array<i64: 32, 128>}, {pipeline_mode = #tpu.pipeline_mode<synchronous>, transform_indices = @transform_3, window_bounds = array<i64: 32, 128>}, {pipeline_mode = #tpu.pipeline_mode<synchronous>, transform_indices = @transform_4, window_bounds = array<i64: 1, 128>}, {pipeline_mode = #tpu.pipeline_mode<synchronous>, transform_indices = @transform_5, window_bounds = array<i64: 1, 128>}, {pipeline_mode = #tpu.pipeline_mode<synchronous>, transform_indices = @transform_6, window_bounds = array<i64: 1, 1>}, {transform_indices = @transform_7, window_bounds = array<i64: 1, 8>}]} {
    %c0 = arith.constant 0 : index
    %c0_0 = arith.constant 0 : index
    %0 = vector.load %arg3[%c0, %c0_0] : memref<32x128xf32, #tpu.memory_space<vmem>>, vector<32x128xf32>
    %c0_1 = arith.constant 0 : index
    %c0_2 = arith.constant 0 : index
    %1 = vector.load %arg4[%c0_1, %c0_2] : memref<32x128xf32, #tpu.memory_space<vmem>>, vector<32x128xf32>
    %c0_3 = arith.constant 0 : index
    %c0_4 = arith.constant 0 : index
    %2 = vector.load %arg5[%c0_3, %c0_4] : memref<1x128xf32, #tpu.memory_space<vmem>>, vector<1x128xf32>
    %c0_5 = arith.constant 0 : index
    %c0_6 = arith.constant 0 : index
    %3 = vector.load %arg6[%c0_5, %c0_6] : memref<1x128xf32, #tpu.memory_space<vmem>>, vector<1x128xf32>
    %c0_7 = arith.constant 0 : index
    %c0_8 = arith.constant 0 : index
    %4 = vector.load %arg7[%c0_7, %c0_8] : memref<1x1xf32, #tpu.memory_space<vmem>>, vector<1x1xf32>
    %c0_9 = arith.constant 0 : index
    %c0_10 = arith.constant 0 : index
    %5 = vector.load %arg1[%c0_9, %c0_10] : memref<8x32xf32, #tpu.memory_space<vmem>>, vector<8x32xf32>
    %c0_11 = arith.constant 0 : index
    %c0_12 = arith.constant 0 : index
    %6 = vector.load %arg2[%c0_11, %c0_12] : memref<8x32xf32, #tpu.memory_space<vmem>>, vector<8x32xf32>
    %cst = arith.constant dense<0.000000e+00> : vector<8x128xf32>
    %7 = tpu.matmul %5, %0, %cst {dimension_numbers = #tpu.dot_dimension_numbers<[1], [0], [0], [1], [0, 0, 1, 1], [], []>} : vector<8x32xf32>, vector<32x128xf32>, vector<8x128xf32> -> vector<8x128xf32>
    %cst_13 = arith.constant dense<0.000000e+00> : vector<8x128xf32>
    %8 = tpu.matmul %6, %1, %cst_13 {dimension_numbers = #tpu.dot_dimension_numbers<[1], [0], [0], [1], [0, 0, 1, 1], [], []>} : vector<8x32xf32>, vector<32x128xf32>, vector<8x128xf32> -> vector<8x128xf32>
    %9 = arith.addf %7, %8 : vector<8x128xf32>
    %10 = vector.broadcast %2 : vector<1x128xf32> to vector<8x128xf32>
    %11 = arith.addf %9, %10 : vector<8x128xf32>
    %cst_14 = arith.constant 0.000000e+00 : f32
    %12 = vector.broadcast %cst_14 : f32 to vector<8x128xf32>
    %13 = arith.maximumf %11, %12 : vector<8x128xf32>
    %cst_15 = arith.constant dense<0.000000e+00> : vector<1x8xf32>
    %14 = tpu.matmul %3, %13, %cst_15 {dimension_numbers = #tpu.dot_dimension_numbers<[1], [1], [0], [0], [0, 0, 1, 0], [], []>} : vector<1x128xf32>, vector<8x128xf32>, vector<1x8xf32> -> vector<1x8xf32>
    %15 = vector.broadcast %4 : vector<1x1xf32> to vector<1x8xf32>
    %16 = arith.addf %14, %15 : vector<1x8xf32>
    %c0_16 = arith.constant 0 : index
    %c0_17 = arith.constant 0 : index
    %17 = vector.load %arg8[%c0_16, %c0_17] : memref<1x8xf32, #tpu.memory_space<vmem>>, vector<1x8xf32>
    tpu.vector_store %arg8[%c0_16, %c0_17], %16 {strides = array<i32>} : memref<1x8xf32, #tpu.memory_space<vmem>>, vector<1x8xf32>,
    return
  }
  func.func @transform_0(%arg0: i32) -> (i32, i32) {
    %c0_i32 = arith.constant 0 : i32
    %c0_i32_0 = arith.constant 0 : i32
    return %arg0, %c0_i32 : i32, i32
  }
  func.func @transform_1(%arg0: i32) -> (i32, i32) {
    %c0_i32 = arith.constant 0 : i32
    %c0_i32_0 = arith.constant 0 : i32
    return %arg0, %c0_i32 : i32, i32
  }
  func.func @transform_2(%arg0: i32) -> (i32, i32) {
    %c0_i32 = arith.constant 0 : i32
    %c0_i32_0 = arith.constant 0 : i32
    %c0_i32_1 = arith.constant 0 : i32
    return %c0_i32, %c0_i32_0 : i32, i32
  }
  func.func @transform_3(%arg0: i32) -> (i32, i32) {
    %c0_i32 = arith.constant 0 : i32
    %c0_i32_0 = arith.constant 0 : i32
    %c0_i32_1 = arith.constant 0 : i32
    return %c0_i32, %c0_i32_0 : i32, i32
  }
  func.func @transform_4(%arg0: i32) -> (i32, i32) {
    %c0_i32 = arith.constant 0 : i32
    %c0_i32_0 = arith.constant 0 : i32
    %c0_i32_1 = arith.constant 0 : i32
    return %c0_i32, %c0_i32_0 : i32, i32
  }
  func.func @transform_5(%arg0: i32) -> (i32, i32) {
    %c0_i32 = arith.constant 0 : i32
    %c0_i32_0 = arith.constant 0 : i32
    %c0_i32_1 = arith.constant 0 : i32
    return %c0_i32, %c0_i32_0 : i32, i32
  }
  func.func @transform_6(%arg0: i32) -> (i32, i32) {
    %c0_i32 = arith.constant 0 : i32
    %c0_i32_0 = arith.constant 0 : i32
    %c0_i32_1 = arith.constant 0 : i32
    return %c0_i32, %c0_i32_0 : i32, i32
  }
  func.func @transform_7(%arg0: i32) -> (i32, i32) {
    %c0_i32 = arith.constant 0 : i32
    %c0_i32_0 = arith.constant 0 : i32
    return %c0_i32, %arg0 : i32, i32
  }
}

</mosaic_0001>

<bundles_post_ra>
// kernel: tpu_custom_call.1
= control target key start
LH: loop header
LB: loop body
LE: loop exit
PB: predicated region body
PF: predicated region fallthrough
CT: control target
= control target key end

     0   :  { %s412_s0 = inlined_call_operand.hbm [shape: f32[8,32], index: 0, kind: input, shape index: {}]   ;;  %s413_s1 = inlined_call_operand.hbm [shape: f32[8,32], index: 1, kind: input, shape index: {}]   ;;  %s414_s2 = inlined_call_operand.hbm [shape: f32[32,128], index: 2, kind: input, shape index: {}]   ;;  %s415_s3 = inlined_call_operand.hbm [shape: f32[32,128], index: 3, kind: input, shape index: {}]   ;;  %s416_s4 = inlined_call_operand.vmem [shape: f32[1,128], index: 4, kind: input, shape index: {}]   ;;  %s417_s5 = inlined_call_operand.vmem [shape: f32[1,128], index: 5, kind: input, shape index: {}]   ;;  %s418_s6 = inlined_call_operand.<no memory space> [shape: f32[1,1], index: 6, kind: input, shape index: {}]   ;;  %s419_s7 = inlined_call_operand.hbm [shape: f32[1,8], index: 7, kind: output, shape index: {}]  }
   0x1   :  { %v12_v0 = vstv %s418_s6 }
   0x2   :  { %13 = vst [vmem:[#allocation2] sm:$0x1] %v12_v0 }
   0x3   :  { %14 = vsyncpa [#allocation4], 0 }
   0x4   :  { %15 = vsyncpa [#allocation7], 0 }
   0x5   :  { %16 = vsyncpa [#allocation10], 0  ;;  %s34_s28 = sshll.u32 %s413_s1, 4  ;;  %s35_s28 = int_to_ptr.hbm [resolvable:$true] %s34_s28 }
   0x6   :  { %17 = vsyncpa [#allocation5], 0  ;;  %s340_s29 = smov [#allocation6]   ;;  %s23_s10 = sshll.u32 %s412_s0, 4  ;;  %s24_s10 = int_to_ptr.hbm [resolvable:$true] %s23_s10 }
   0x7   :  { %s36_s30 = sshll.u32 %s340_s29, 4  ;;  %s341_s6 = smov [#allocation3]   ;;  %s37_s30 = int_to_ptr.vmem [resolvable:$true] %s36_s30 }
   0x8   :  { %39 = dma.hbm_to_vmem [thread:$0]  %s35_s28, 128, %s37_s30, [#allocation7]  }
   0x9   :  { %s25_s11 = sshll.u32 %s341_s6, 4  ;;  %s44_s14 = sshll.u32 %s414_s2, 4  ;;  %s26_s11 = int_to_ptr.vmem [resolvable:$true] %s25_s11  ;;  %s45_s14 = int_to_ptr.hbm [resolvable:$true] %s44_s14 }
   0xa   :  { %28 = dma.hbm_to_vmem [thread:$0]  %s24_s10, 128, %s26_s11, [#allocation4]  }
   0xb   :  { %s342_s1 = smov [#allocation8]   ;;  %s57_s18 = sshll.u32 %s415_s3, 4  ;;  %s58_s18 = int_to_ptr.hbm [resolvable:$true] %s57_s18 }
   0xc   :  { %s46_s15 = sshll.u32 %s342_s1, 4  ;;  %s343_s19 = smov 128   ;;  %s47_s15 = int_to_ptr.vmem [resolvable:$true] %s46_s15 }
   0xd   :  { %s344_s0 = smov 8   ;;  %s345_s20 = smov [#allocation9]  }
   0xe   :  { %52 = dma.hbm_to_vmem [thread:$0]  %s45_s14, 512, %s47_s15, [#allocation7], %s343_s19, %s343_s19, %s344_s0  }
   0xf   :  { %s59_s21 = sshll.u32 %s345_s20, 4  ;;  %s60_s21 = int_to_ptr.vmem [resolvable:$true] %s59_s21 }
  0x10   :  { %65 = dma.hbm_to_vmem [thread:$0]  %s58_s18, 512, %s60_s21, [#allocation10], %s343_s19, %s343_s19, %s344_s0  }
  0x11   :  { %332 = dma.done.wait [#allocation4], 128  }
  0x12   :  { %333 = vsyncadd [#allocation4], 4294967168 }
  0x13   :  { %334 = dma.done.wait [#allocation7], 640  }
  0x14   :  { %335 = vsyncadd [#allocation7], 4294966656 }
  0x15   :  { %336 = dma.done.wait [#allocation10], 512  }
  0x16   :  { %337 = vsyncadd [#allocation10], 4294966784  ;;  %v95_v1 = vld [vmem:[#allocation9 + $0x18] sm:$0xff]  ;;  %v94_v3 = vld [vmem:[#allocation9 + $0x10] sm:$0xff]  ;;  %vm101_vm0 = vcmask 261120   ;;  %v346_v12 = vmov 0  }
  0x17   :  { %v91_v2 = vld [vmem:[#allocation8 + $0x18] sm:$0xff]  ;;  %117 = vmatpush.msra.mxu0 %v95_v1  ;;  %v90_v4 = vld [vmem:[#allocation8 + $0x10] sm:$0xff]  ;;  %v93_v5 = vld [vmem:[#allocation9 + $0x8] sm:$0xff]  ;;  %210 = vset.pattern.permute.xlu0 %v346_v12  ;;  %s347_s24 = smov [#allocation11]   ;;  %s188_s28 = sshll.u32 %s419_s7, 4  ;;  %vm179_vm1 = vcmask 57344   ;;  %s189_s28 = int_to_ptr.hbm [resolvable:$true] %s188_s28 }
  0x18   :  { %140 = vmatpush.msra.mxu1 %v91_v2  ;;  %v89_v6 = vld [vmem:[#allocation8 + $0x8] sm:$0xff]  ;;  %v92_v7 = vld [vmem:[#allocation9] sm:$0xff]  ;;  %v100_v9 = vld [vmem:[#allocation6] sm:$0xff]  ;;  %s186_s25 = sshll.u32 %s347_s24, 4  ;;  %s187_s25 = int_to_ptr.vmem [resolvable:$true] %s186_s25 }
  0x19   :  { %118 = vmatpush.msra.mxu0 %v94_v3  ;;  %v88_v8 = vld [vmem:[#allocation8] sm:$0xff]  ;;  %v99_v10 = vld [vmem:[#allocation3] sm:$0xff]  ;;  %v98_v11 = vld [vmem:[#allocation2] sm:$0x1] }
  0x1a   :  { %141 = vmatpush.msra.mxu1 %v90_v4  ;;  %155 = vperm.xlu0 %210, %v98_v11   ;;  %v211_v13 = vld [vmem:[%s416_s4] ss:$0 sm:$0xff] }
  0x1b   :  { %119 = vmatpush.msra.mxu0 %v93_v5  ;;  %v97_v19 = vld [vmem:[%s417_s5] sm:$0x1] }
  0x1c   :  { %142 = vmatpush.msra.mxu1 %v89_v6 }
  0x1d   :  { %120 = vmatpush.msra.mxu0 %v92_v7 }
  0x1e   :  { %143 = vmatpush.msra.mxu1 %v88_v8  ;;  %200 = vmatmul.msk.f32.vlgmr.msra.gmra.mxu0 %vm101_vm0, %v100_v9 }
  0x1f   :  { %201 = vmatmul.msk.f32.vlgmr.msra.gmra.mxu1 %vm101_vm0, %v99_v10 }
  0x8c   :  { %v156_v20 = vpop.permute.xlu0 %155 }
  0x8d   :  { %v158_v21 = vperm.slane %v156_v20, 0 }
  0x9b   :  { %v122_v14 = vpop.f32.mrf.mxu0 }
  0x9c   :  { %v145_v15 = vpop.f32.mrf.mxu1 }
  0x9d   :  { %v146_v16 = vadd.f32 %v145_v15, %v122_v14 }
  0x9f   :  { %v151_v17 = vadd.f32 %v211_v13, %v146_v16 }
  0xa1   :  { %v152_v18 = vmax.f32 %v151_v17, 0.0 }
  0xa3   :  { %174 = vmatpush.xpose.msra.mxu2 %v152_v18 }
  0xa6   :  { %175 = vmatmul.f32.vlgmr.msra.gmra.mxu2 %v97_v19 }
 0x129   :  { %v176_v22 = vpop.f32.mrf.mxu2 }
 0x12a   :  { %v177_v23 = vadd.f32 %v176_v22, %v158_v21 }
 0x12c   :  { %180 = vst.msk [vmem:[#allocation11] sm:$0x1] %vm179_vm1, %v177_v23 }
 0x12d   :  { %191 = dma.vmem_to_hbm [thread:$0]  %s187_s25, 16, %s189_s28, [#allocation5]  }
 0x12e   :  { %338 = dma.done.wait [#allocation5], 16  }
 0x12f   :  { %339 = vsyncadd [#allocation5], 4294967280 }
 0x130   :  { %196 = vsyncpa [#allocation4], 1 }
 0x131   :  { %197 = vsyncpa [#allocation7], 1 }
 0x132   :  { %198 = vsyncpa [#allocation10], 1 }
 0x133   :  { %199 = vsyncpa [#allocation5], 1 }

</bundles_post_ra>
